<compile_context>
chip_gen: v7x
topology: tpu7x:2x2x1
jax: 0.10.0
libtpu: 0.0.40
codegen_flags: <defaults>
</compile_context>

<pallas_src>
import functools

import jax
import jax.numpy as jnp
from jax import lax
from jax.experimental import pallas as pl
from jax.experimental.pallas import tpu as pltpu


def _round_up(x, m):
    return (x + m - 1) // m * m


def _expert_matmul_kernel(x_ref, w_ref, o_ref, acc_ref):
    """One (tm, tn) output tile; K is the last (reduction) grid axis.

    x_ref  : (tm, tk)  activation tile
    w_ref  : (tn, tk)  weight tile in nn.Linear layout (out, in); the MXU
                       contracts the shared K axis directly (x @ w.T)
    o_ref  : (tm, tn)  output tile, written once on the last K step
    acc_ref: (tm, tn)  float32 VMEM accumulator, resident across the K axis
    """

    @pl.when(pl.program_id(2) == 0)
    def _():
        acc_ref[...] = jnp.zeros_like(acc_ref)

    acc_ref[...] += lax.dot_general(
        x_ref[...],
        w_ref[...],
        dimension_numbers=(((1,), (1,)), ((), ())),  # contract in_features axes
        preferred_element_type=jnp.float32,
    )

    @pl.when(pl.program_id(2) == pl.num_programs(2) - 1)
    def _():
        o_ref[...] = acc_ref[...].astype(o_ref.dtype)


def _choose_tiles(m, k, n):
    # (8,128) rule: tm % 8 == 0, tn % 128 == 0, tk % 128 == 0.
    # Caps keep double-buffered inputs + the f32 accumulator comfortably under
    # the default scoped-VMEM limit on every generation (v5e 16 MiB scoped,
    # v6e 32 MiB, v7x 32 MiB scoped / 64 MiB physical):
    #   bf16: 2*(256*512 + 256*512)*2B + 256*256*4B  ~= 1.3 MiB
    #   f32 : 2*(256*512 + 256*512)*4B + 256*256*4B  ~= 2.3 MiB
    tm = min(256, _round_up(m, 8))
    tn = min(256, _round_up(n, 128))
    tk = min(512, _round_up(k, 128))
    return tm, tn, tk


@functools.partial(jax.jit, static_argnames=("compute_dtype",))
def expert_forward(x, weight, compute_dtype=None):
    """Pallas implementation of Expert.forward.

    x            : (..., in_features)
    weight       : (out_features, in_features)  -- nn.Linear.weight convention
    compute_dtype: optional dtype (e.g. jnp.bfloat16) for MXU inputs; the
                   accumulation stays float32 and the output keeps x.dtype.
    returns      : (..., out_features)
    """
    out_features, in_features = weight.shape
    assert x.shape[-1] == in_features

    lead_shape = x.shape[:-1]
    m = 1
    for d in lead_shape:
        m *= d
    x2d = x.reshape(m, in_features)

    out_dtype = x.dtype
    if compute_dtype is not None:
        x2d = x2d.astype(compute_dtype)
        weight = weight.astype(compute_dtype)

    tm, tn, tk = _choose_tiles(m, in_features, out_features)
    m_p = _round_up(m, tm)
    k_p = _round_up(in_features, tk)
    n_p = _round_up(out_features, tn)

    # Pad to lane/sublane-aligned, tile-divisible shapes. Zero K-padding
    # contributes zeros to the accumulator; M/N padding is sliced off below.
    # For production shapes that are already 128-aligned these are no-ops
    # (ideally the weight would be stored pre-padded at parameter init).
    if (m_p, k_p) != (m, in_features):
        x2d = jnp.pad(x2d, ((0, m_p - m), (0, k_p - in_features)))
    if (n_p, k_p) != (out_features, in_features):
        weight = jnp.pad(weight, ((0, n_p - out_features), (0, k_p - in_features)))

    grid = (m_p // tm, n_p // tn, k_p // tk)

    in_itemsize = jnp.dtype(x2d.dtype).itemsize
    cost = pl.CostEstimate(
        flops=2 * m_p * n_p * k_p,
        transcendentals=0,
        bytes_accessed=(m_p * k_p + n_p * k_p) * in_itemsize
        + m_p * n_p * jnp.dtype(out_dtype).itemsize,
    )

    out = pl.pallas_call(
        _expert_matmul_kernel,
        out_shape=jax.ShapeDtypeStruct((m_p, n_p), out_dtype),
        grid_spec=pltpu.PrefetchScalarGridSpec(
            num_scalar_prefetch=0,
            grid=grid,
            in_specs=[
                pl.BlockSpec((tm, tk), lambda i, j, k: (i, k)),
                pl.BlockSpec((tn, tk), lambda i, j, k: (j, k)),
            ],
            out_specs=pl.BlockSpec((tm, tn), lambda i, j, k: (i, j)),
            scratch_shapes=[pltpu.VMEM((tm, tn), jnp.float32)],
        ),
        compiler_params=pltpu.CompilerParams(
            dimension_semantics=("parallel", "parallel", "arbitrary"),
        ),
        cost_estimate=cost,
    )(x2d, weight)

    out = out[:m, :out_features]
    return out.reshape(*lead_shape, out_features)


def init_expert_params(key, in_features, out_features, dtype=jnp.float32):
    # Deterministic synthetic init (nn.Linear uses kaiming_uniform; exact init
    # values don't matter for kernel semantics, only the shape/contract).
    bound = 1.0 / (in_features ** 0.5)
    weight = jax.random.uniform(
        key, (out_features, in_features), dtype=dtype, minval=-bound, maxval=bound
    )
    return weight


# TODO(synk): if Expert is invoked per-expert in a Python MoE loop, replace the
# per-expert pallas_call with a single grouped matmul using
# PrefetchScalarGridSpec(num_scalar_prefetch=...) and group-offset index_maps.


if __name__ == "__main__":
    key = jax.random.PRNGKey(0)
    k_x, k_w = jax.random.split(key)

    batch, seq, in_features, out_features = 2, 8, 32, 64
    x = jax.random.normal(k_x, (batch, seq, in_features), dtype=jnp.float32)
    weight = init_expert_params(k_w, in_features, out_features, dtype=jnp.float32)

    # Exact-semantics path (compute dtype == input dtype == f32).
    y = expert_forward(x, weight)
    y = jax.block_until_ready(y)

    y_ref = jnp.einsum("bsi,oi->bso", x, weight)
    assert y.shape == (batch, seq, out_features)
    assert jnp.allclose(y, y_ref, atol=1e-5, rtol=1e-5)

    # High-throughput path: bf16 MXU inputs, f32 accumulation.
    y_bf16 = expert_forward(x, weight, compute_dtype=jnp.bfloat16)
    y_bf16 = jax.block_until_ready(y_bf16)
    assert y_bf16.shape == (batch, seq, out_features)
    assert jnp.allclose(y_bf16, y_ref, atol=5e-2, rtol=5e-2)

    print("KERNEL_OK")
</pallas_src>

<mosaic_0001>
module attributes {stable_mosaic.version = 11 : i64} {
  func.func @_expert_matmul_kernel(%arg0: i32, %arg1: i32, %arg2: i32, %arg3: memref<16x128xf32, #tpu.memory_space<vmem>>, %arg4: memref<128x128xf32, #tpu.memory_space<vmem>>, %arg5: memref<16x128xf32, #tpu.memory_space<vmem>>, %arg6: memref<16x128xf32, #tpu.memory_space<vmem>>) attributes {dimension_semantics = [#tpu.dimension_semantics<parallel>, #tpu.dimension_semantics<parallel>, #tpu.dimension_semantics<arbitrary>], iteration_bounds = array<i64: 1, 1, 1>, scalar_prefetch = 0 : i64, scratch_operands = 1 : i64, tpu.core_type = #tpu.core_type<tc>, window_params = [{transform_indices = @transform_0, window_bounds = array<i64: 16, 128>}, {transform_indices = @transform_1, window_bounds = array<i64: 128, 128>}, {transform_indices = @transform_2, window_bounds = array<i64: 16, 128>}]} {
    %c0_i32 = arith.constant 0 : i32
    %0 = arith.cmpi eq, %arg2, %c0_i32 : i32
    %1 = arith.extui %0 : i1 to i32
    %c0_i32_0 = arith.constant 0 : i32
    %2 = arith.cmpi ne, %1, %c0_i32_0 : i32
    scf.if %2 {
      %cst_10 = arith.constant 0.000000e+00 : f32
      %12 = vector.broadcast %cst_10 : f32 to vector<16x128xf32>
      %c0_11 = arith.constant 0 : index
      %c0_12 = arith.constant 0 : index
      %13 = vector.load %arg6[%c0_11, %c0_12] : memref<16x128xf32, #tpu.memory_space<vmem>>, vector<16x128xf32>
      tpu.vector_store %arg6[%c0_11, %c0_12], %12 {strides = array<i32>} : memref<16x128xf32, #tpu.memory_space<vmem>>, vector<16x128xf32>,
    } else {
    }
    %c0 = arith.constant 0 : index
    %c0_1 = arith.constant 0 : index
    %3 = vector.load %arg6[%c0, %c0_1] : memref<16x128xf32, #tpu.memory_space<vmem>>, vector<16x128xf32>
    %c0_2 = arith.constant 0 : index
    %c0_3 = arith.constant 0 : index
    %4 = vector.load %arg3[%c0_2, %c0_3] : memref<16x128xf32, #tpu.memory_space<vmem>>, vector<16x128xf32>
    %c0_4 = arith.constant 0 : index
    %c0_5 = arith.constant 0 : index
    %5 = vector.load %arg4[%c0_4, %c0_5] : memref<128x128xf32, #tpu.memory_space<vmem>>, vector<128x128xf32>
    %cst = arith.constant dense<0.000000e+00> : vector<16x128xf32>
    %6 = tpu.matmul %4, %5, %cst {dimension_numbers = #tpu.dot_dimension_numbers<[1], [1], [0], [0], [0, 0, 1, 0], [], []>} : vector<16x128xf32>, vector<128x128xf32>, vector<16x128xf32> -> vector<16x128xf32>
    %7 = arith.addf %3, %6 : vector<16x128xf32>
    %c0_6 = arith.constant 0 : index
    %c0_7 = arith.constant 0 : index
    %8 = vector.load %arg6[%c0_6, %c0_7] : memref<16x128xf32, #tpu.memory_space<vmem>>, vector<16x128xf32>
    tpu.vector_store %arg6[%c0_6, %c0_7], %7 {strides = array<i32>} : memref<16x128xf32, #tpu.memory_space<vmem>>, vector<16x128xf32>,
    %c0_i32_8 = arith.constant 0 : i32
    %9 = arith.cmpi eq, %arg2, %c0_i32_8 : i32
    %10 = arith.extui %9 : i1 to i32
    %c0_i32_9 = arith.constant 0 : i32
    %11 = arith.cmpi ne, %10, %c0_i32_9 : i32
    scf.if %11 {
      %c0_10 = arith.constant 0 : index
      %c0_11 = arith.constant 0 : index
      %12 = vector.load %arg6[%c0_10, %c0_11] : memref<16x128xf32, #tpu.memory_space<vmem>>, vector<16x128xf32>
      %c0_12 = arith.constant 0 : index
      %c0_13 = arith.constant 0 : index
      %13 = vector.load %arg5[%c0_12, %c0_13] : memref<16x128xf32, #tpu.memory_space<vmem>>, vector<16x128xf32>
      tpu.vector_store %arg5[%c0_12, %c0_13], %12 {strides = array<i32>} : memref<16x128xf32, #tpu.memory_space<vmem>>, vector<16x128xf32>,
    } else {
    }
    return
  }
  func.func @transform_0(%arg0: i32, %arg1: i32, %arg2: i32) -> (i32, i32) {
    %c0_i32 = arith.constant 0 : i32
    return %arg0, %arg2 : i32, i32
  }
  func.func @transform_1(%arg0: i32, %arg1: i32, %arg2: i32) -> (i32, i32) {
    %c0_i32 = arith.constant 0 : i32
    return %arg1, %arg2 : i32, i32
  }
  func.func @transform_2(%arg0: i32, %arg1: i32, %arg2: i32) -> (i32, i32) {
    %c0_i32 = arith.constant 0 : i32
    return %arg0, %arg1 : i32, i32
  }
}

</mosaic_0001>

<bundles_post_ra>
// kernel: expert_forward.1
= control target key start
LH: loop header
LB: loop body
LE: loop exit
PB: predicated region body
PF: predicated region fallthrough
CT: control target
= control target key end

     0   :  { %s287_s1 = inlined_call_operand.vmem [shape: f32[128,128], index: 1, kind: input, shape index: {}]   ;;  %s288_s0 = inlined_call_operand.vmem [shape: f32[16,128], index: 0, kind: input, shape index: {}]   ;;  %s289_s2 = inlined_call_operand.vmem [shape: f32[16,128], index: 2, kind: output, shape index: {}]  }
   0x1   :  { %v21_v0 = vld [vmem:[%s287_s1] sm:$0xff]  ;;  %v22_v1 = vld [vmem:[%s287_s1 + $0x8] sm:$0xff]  ;;  %v23_v2 = vld [vmem:[%s287_s1 + $0x10] sm:$0xff] }
   0x2   :  { %v180_v3 = vpack.c.bf16 %v22_v1, %v21_v0  ;;  %v24_v4 = vld [vmem:[%s287_s1 + $0x18] sm:$0xff]  ;;  %v19_v6 = vld [vmem:[%s288_s0] sm:$0xff]  ;;  %v26_v8 = vld [vmem:[%s287_s1 + $0x28] sm:$0xff] }
   0x3   :  { %v184_v5 = vpack.c.bf16 %v24_v4, %v23_v2  ;;  %v25_v7 = vld [vmem:[%s287_s1 + $0x20] sm:$0xff]  ;;  %177 = vmatprep.mubr.f32.mxu0 %v19_v6  ;;  %v27_v10 = vld [vmem:[%s287_s1 + $0x30] sm:$0xff]  ;;  %v28_v11 = vld [vmem:[%s287_s1 + $0x38] sm:$0xff] }
   0x4   :  { %181 = vmatprep.subr.bf16.mxu0 %v180_v3  ;;  %v188_v9 = vpack.c.bf16 %v26_v8, %v25_v7  ;;  %v192_v12 = vpack.c.bf16 %v28_v11, %v27_v10  ;;  %v29_v13 = vld [vmem:[%s287_s1 + $0x40] sm:$0xff]  ;;  %v30_v14 = vld [vmem:[%s287_s1 + $0x48] sm:$0xff]  ;;  %v31_v16 = vld [vmem:[%s287_s1 + $0x50] sm:$0xff] }
   0x5   :  { %183 = vmatpush3.bf16.xpose.msra.mxu0 %v180_v3  ;;  %v196_v15 = vpack.c.bf16 %v30_v14, %v29_v13  ;;  %v32_v17 = vld [vmem:[%s287_s1 + $0x58] sm:$0xff]  ;;  %v33_v19 = vld [vmem:[%s287_s1 + $0x60] sm:$0xff]  ;;  %v34_v20 = vld [vmem:[%s287_s1 + $0x68] sm:$0xff] }
   0x6   :  { %185 = vmatprep.subr.bf16.mxu0 %v184_v5  ;;  %v200_v18 = vpack.c.bf16 %v32_v17, %v31_v16  ;;  %v204_v21 = vpack.c.bf16 %v34_v20, %v33_v19  ;;  %v35_v22 = vld [vmem:[%s287_s1 + $0x70] sm:$0xff]  ;;  %v36_v23 = vld [vmem:[%s287_s1 + $0x78] sm:$0xff]  ;;  %v20_v25 = vld [vmem:[%s288_s0 + $0x8] sm:$0xff] }
   0x7   :  { %v208_v24 = vpack.c.bf16 %v36_v23, %v35_v22 }
   0xd   :  { %187 = vmatpush3.bf16.xpose.msra.mxu0 %v184_v5 }
   0xe   :  { %189 = vmatprep.subr.bf16.mxu0 %v188_v9 }
  0x15   :  { %191 = vmatpush3.bf16.xpose.msra.mxu0 %v188_v9 }
  0x16   :  { %193 = vmatprep.subr.bf16.mxu0 %v192_v12 }
  0x1d   :  { %195 = vmatpush3.bf16.xpose.msra.mxu0 %v192_v12 }
  0x1e   :  { %197 = vmatprep.subr.bf16.mxu0 %v196_v15 }
  0x25   :  { %199 = vmatpush3.bf16.xpose.msra.mxu0 %v196_v15 }
  0x26   :  { %201 = vmatprep.subr.bf16.mxu0 %v200_v18 }
  0x2d   :  { %203 = vmatpush3.bf16.xpose.msra.mxu0 %v200_v18 }
  0x2e   :  { %205 = vmatprep.subr.bf16.mxu0 %v204_v21 }
  0x35   :  { %207 = vmatpush3.bf16.xpose.msra.mxu0 %v204_v21 }
  0x36   :  { %209 = vmatprep.subr.bf16.mxu0 %v208_v24 }
  0x3d   :  { %211 = vmatpush3.bf16.xpose.msra.mxu0 %v208_v24 }
  0x44   :  { %178 = vmatmul.mubr.f32.vlgmr.msra.gmra.mrb[0].mxu0 %v20_v25 }
 0x117   :  { %v179_v26 = vpop.f32.mrb[0].mxu0 }
 0x118   :  { %122 = vst [vmem:[%s289_s2 + $0x8] sm:$0xff] %v179_v26  ;;  %v103_v27 = vpop.f32.mrb[1].mxu0 }
 0x119   :  { %121 = vst [vmem:[%s289_s2] sm:$0xff] %v103_v27 }

</bundles_post_ra>
